<compile_context>
chip_gen: v5e
topology: v5e:2x2
jax: 0.10.0
libtpu: 0.0.40
codegen_flags: <defaults>
</compile_context>

<pallas_src>
import functools

import jax
import jax.numpy as jnp
from jax.experimental import pallas as pl
from jax.experimental.pallas import tpu as pltpu


def _round_up(x, m):
    return (x + m - 1) // m * m


def _fused_kernel(x_ref, w_ref, b_ref, o_ref, *, kernel_sizes, S, Dp):
    """Fused multi-width conv + time-max + bias + ReLU.

    x_ref: (TB, S, C)          bf16  input tile (one batch block)
    w_ref: (C, sum_K K*Dp)     bf16  all (branch, k-offset) filters, column-packed
    b_ref: (nb, Dp)            f32   per-branch bias, zero-padded to Dp
    o_ref: (TB, nb*Dp)         f32   pooled features, branch-major 128-aligned columns
    """
    # One wide matmul covering every (branch, k-offset) projection -> (TB, S, totN) f32.
    z = jax.lax.dot_general(
        x_ref[...], w_ref[...],
        dimension_numbers=(((2,), (0,)), ((), ())),
        preferred_element_type=jnp.float32,
    )

    col = 0
    for j, K in enumerate(kernel_sizes):
        L = S - K + 1
        # Sum the K time-shifted projections. Shifts are applied to the matmul
        # output; lane slices are 128-aligned because Dp % 128 == 0.
        acc = z[:, 0:L, col:col + Dp]
        for k in range(1, K):
            acc = acc + z[:, k:k + L, col + k * Dp:col + (k + 1) * Dp]
        col += K * Dp
        # Max over time first, then bias + ReLU on the small (TB, Dp) result
        # (exact: max_t ReLU(a_t + b) == ReLU(max_t a_t + b)).
        m = jnp.max(acc, axis=1)                                 # (TB, Dp)
        m = jnp.maximum(m + b_ref[j:j + 1, :], 0.0)
        o_ref[:, j * Dp:(j + 1) * Dp] = m.astype(o_ref.dtype)


def _fused_forward(x, w_all, b_all, *, kernel_sizes, Dp, max_tb=64):
    """x: (B, S, C) bf16, w_all: (C, totN) bf16, b_all: (nb, Dp) f32 -> (B, nb*Dp) f32."""
    B, S, C = x.shape
    nb = len(kernel_sizes)
    totN = w_all.shape[1]
    # TB == B (full dim) when B is small, otherwise a multiple of 8 -> valid block shape.
    TB = B if B < max_tb else max_tb
    grid = (pl.cdiv(B, TB),)

    kern = functools.partial(_fused_kernel, kernel_sizes=tuple(kernel_sizes), S=S, Dp=Dp)
    flops = 2 * B * S * C * totN
    bytes_accessed = (x.size * x.dtype.itemsize
                      + w_all.size * w_all.dtype.itemsize
                      + b_all.size * b_all.dtype.itemsize
                      + B * nb * Dp * 4)

    return pl.pallas_call(
        kern,
        out_shape=jax.ShapeDtypeStruct((B, nb * Dp), jnp.float32),
        grid_spec=pltpu.PrefetchScalarGridSpec(
            num_scalar_prefetch=0,
            grid=grid,
            in_specs=[
                pl.BlockSpec((TB, S, C), lambda i: (i, 0, 0)),   # batch-tiled input
                pl.BlockSpec((C, totN), lambda i: (0, 0)),       # weights resident
                pl.BlockSpec((nb, Dp), lambda i: (0, 0)),        # bias resident
            ],
            out_specs=pl.BlockSpec((TB, nb * Dp), lambda i: (i, 0)),
        ),
        compiler_params=pltpu.CompilerParams(
            dimension_semantics=("parallel",),       # shard batch tiles across TCs (v7x)
            vmem_limit_bytes=64 * 1024 * 1024,
        ),
        cost_estimate=pl.CostEstimate(
            flops=flops, transcendentals=0, bytes_accessed=bytes_accessed),
    )(x, w_all, b_all)


class MultiFilterCNNPallas:
    """JAX/Pallas port of bhabana.models.MultiFilterCNN."""

    def __init__(self, in_channels, kernel_dim=100, kernel_sizes=(3, 4, 5),
                 dropout=0.5, seed=0, compute_dtype=jnp.bfloat16):
        self.in_channels = in_channels
        self.kernel_dim = kernel_dim
        self.kernel_sizes = tuple(kernel_sizes)
        self.dropout_p = dropout
        self.compute_dtype = compute_dtype
        self.Dp = _round_up(kernel_dim, 128)          # lane-aligned feature width

        # Deterministic parameter init (uniform, PyTorch-Conv2d-like ranges).
        key = jax.random.PRNGKey(seed)
        self.weights = []   # each: (K, C, D)  == torch weight (D,1,K,C) transposed
        self.biases = []    # each: (D,)
        for i, K in enumerate(self.kernel_sizes):
            kw, kb = jax.random.split(jax.random.fold_in(key, i))
            fan_in = K * in_channels
            bound = 1.0 / jnp.sqrt(fan_in)
            w = jax.random.uniform(kw, (K, in_channels, kernel_dim),
                                   jnp.float32, -bound, bound)
            b = jax.random.uniform(kb, (kernel_dim,), jnp.float32, -bound, bound)
            self.weights.append(w)
            self.biases.append(b)

        # Pack all branches/offsets into one wide, 128-padded weight matrix
        # (C, sum_K K*Dp) in the MXU compute dtype, and a (nb, Dp) f32 bias table.
        w_cols, b_rows = [], []
        for w, b in zip(self.weights, self.biases):
            K = w.shape[0]
            w_pad = jnp.zeros((K, in_channels, self.Dp), jnp.float32)
            w_pad = w_pad.at[:, :, :kernel_dim].set(w)
            for k in range(K):
                w_cols.append(w_pad[k])                              # (C, Dp)
            b_rows.append(jnp.zeros((self.Dp,), jnp.float32).at[:kernel_dim].set(b))
        self.w_all = jnp.concatenate(w_cols, axis=1).astype(compute_dtype)
        self.b_all = jnp.stack(b_rows, axis=0)                       # (nb, Dp) f32

    def __call__(self, data):
        x = data['inputs']                                  # (B, S, C)
        B = x.shape[0]
        nb = len(self.kernel_sizes)

        out_padded = _fused_forward(
            x.astype(self.compute_dtype), self.w_all, self.b_all,
            kernel_sizes=self.kernel_sizes, Dp=self.Dp)     # (B, nb*Dp)

        out = (out_padded.reshape(B, nb, self.Dp)[:, :, :self.kernel_dim]
               .reshape(B, nb * self.kernel_dim))

        if data.get('training', False):
            # Inverted dropout. NOTE: PRNG stream differs from PyTorch (semantics match).
            key = data.get('rng', jax.random.PRNGKey(0))
            keep = 1.0 - self.dropout_p
            mask = jax.random.bernoulli(key, keep, out.shape)
            out = jnp.where(mask, out / keep, 0.0)

        data['out'] = out
        return data


def _reference(x, weights, biases, kernel_sizes, compute_dtype=jnp.bfloat16):
    """Pure-JAX reference with the same operand precision (bf16 operands, f32 accum)."""
    B, S, C = x.shape
    xq = x.astype(compute_dtype).astype(jnp.float32)
    outs = []
    for K, w, b in zip(kernel_sizes, weights, biases):
        wq = w.astype(compute_dtype).astype(jnp.float32)
        L = S - K + 1
        acc = jnp.zeros((B, L, w.shape[-1]), jnp.float32)
        for k in range(K):
            acc = acc + jnp.einsum('blc,cd->bld', xq[:, k:k + L, :], wq[k],
                                   precision=jax.lax.Precision.HIGHEST)
        acc = jnp.maximum(acc + b[None, None, :], 0.0)
        outs.append(jnp.max(acc, axis=1))
    return jnp.concatenate(outs, axis=1)


if __name__ == "__main__":
    B, S, C = 2, 16, 8            # batch, sequence length, embedding (in_channels)
    D = 32                        # kernel_dim
    kernel_sizes = (3, 4, 5)

    model = MultiFilterCNNPallas(in_channels=C, kernel_dim=D,
                                 kernel_sizes=kernel_sizes, dropout=0.5, seed=0)

    x = jax.random.normal(jax.random.PRNGKey(0), (B, S, C), jnp.float32)
    data = {'inputs': x, 'training': False}

    out = model(data)['out']
    out = jax.block_until_ready(out)

    ref = _reference(x, model.weights, model.biases, kernel_sizes)
    assert out.shape == (B, D * len(kernel_sizes)), out.shape
    assert jnp.allclose(out, ref, atol=1e-4, rtol=1e-4), "mismatch vs JAX reference"

    print("KERNEL_OK")
</pallas_src>

<mosaic_0001>
module attributes {stable_mosaic.version = 11 : i64} {
  func.func @_fused_kernel(%arg0: i32, %arg1: memref<2x16x8xbf16, #tpu.memory_space<vmem>>, %arg2: memref<8x1536xbf16, #tpu.memory_space<vmem>>, %arg3: memref<3x128xf32, #tpu.memory_space<vmem>>, %arg4: memref<2x384xf32, #tpu.memory_space<vmem>>) attributes {dimension_semantics = [#tpu.dimension_semantics<parallel>], iteration_bounds = array<i64: 1>, scalar_prefetch = 0 : i64, scratch_operands = 0 : i64, tpu.core_type = #tpu.core_type<tc>, window_params = [{transform_indices = @transform_0, window_bounds = array<i64: 2, 16, 8>}, {pipeline_mode = #tpu.pipeline_mode<synchronous>, transform_indices = @transform_1, window_bounds = array<i64: 8, 1536>}, {pipeline_mode = #tpu.pipeline_mode<synchronous>, transform_indices = @transform_2, window_bounds = array<i64: 3, 128>}, {transform_indices = @transform_3, window_bounds = array<i64: 2, 384>}]} {
    %c0 = arith.constant 0 : index
    %c0_0 = arith.constant 0 : index
    %c0_1 = arith.constant 0 : index
    %0 = vector.load %arg1[%c0, %c0_0, %c0_1] : memref<2x16x8xbf16, #tpu.memory_space<vmem>>, vector<2x16x8xbf16>
    %c0_2 = arith.constant 0 : index
    %c0_3 = arith.constant 0 : index
    %1 = vector.load %arg2[%c0_2, %c0_3] : memref<8x1536xbf16, #tpu.memory_space<vmem>>, vector<8x1536xbf16>
    %cst = arith.constant dense<0.000000e+00> : vector<2x16x1536xf32>
    %2 = tpu.matmul %0, %1, %cst {dimension_numbers = #tpu.dot_dimension_numbers<[2], [0], [0, 1], [1], [0, 0, 0, 1, 1, 1], [], []>} : vector<2x16x8xbf16>, vector<8x1536xbf16>, vector<2x16x1536xf32> -> vector<2x16x1536xf32>
    %3 = vector.extract_strided_slice %2 {offsets = [0, 0, 0], sizes = [2, 14, 128], strides = [1, 1, 1]} : vector<2x16x1536xf32> to vector<2x14x128xf32>
    %4 = vector.extract_strided_slice %2 {offsets = [0, 1, 128], sizes = [2, 14, 128], strides = [1, 1, 1]} : vector<2x16x1536xf32> to vector<2x14x128xf32>
    %5 = arith.addf %3, %4 : vector<2x14x128xf32>
    %6 = vector.extract_strided_slice %2 {offsets = [0, 2, 256], sizes = [2, 14, 128], strides = [1, 1, 1]} : vector<2x16x1536xf32> to vector<2x14x128xf32>
    %7 = arith.addf %5, %6 : vector<2x14x128xf32>
    %cst_4 = arith.constant dense<0xFF800000> : vector<2x128xf32>
    %8 = vector.multi_reduction <maximumf>, %7, %cst_4 [1] : vector<2x14x128xf32> to vector<2x128xf32>
    %c0_5 = arith.constant 0 : index
    %c0_6 = arith.constant 0 : index
    %9 = vector.load %arg3[%c0_5, %c0_6] : memref<3x128xf32, #tpu.memory_space<vmem>>, vector<1x128xf32>
    %10 = vector.broadcast %9 : vector<1x128xf32> to vector<2x128xf32>
    %11 = arith.addf %8, %10 : vector<2x128xf32>
    %cst_7 = arith.constant 0.000000e+00 : f32
    %12 = vector.broadcast %cst_7 : f32 to vector<2x128xf32>
    %13 = arith.maximumf %11, %12 : vector<2x128xf32>
    %c0_8 = arith.constant 0 : index
    %c0_9 = arith.constant 0 : index
    %14 = vector.load %arg4[%c0_8, %c0_9] : memref<2x384xf32, #tpu.memory_space<vmem>>, vector<2x128xf32>
    tpu.vector_store %arg4[%c0_8, %c0_9], %13 {strides = array<i32>} : memref<2x384xf32, #tpu.memory_space<vmem>>, vector<2x128xf32>,
    %15 = vector.extract_strided_slice %2 {offsets = [0, 0, 384], sizes = [2, 13, 128], strides = [1, 1, 1]} : vector<2x16x1536xf32> to vector<2x13x128xf32>
    %16 = vector.extract_strided_slice %2 {offsets = [0, 1, 512], sizes = [2, 13, 128], strides = [1, 1, 1]} : vector<2x16x1536xf32> to vector<2x13x128xf32>
    %17 = arith.addf %15, %16 : vector<2x13x128xf32>
    %18 = vector.extract_strided_slice %2 {offsets = [0, 2, 640], sizes = [2, 13, 128], strides = [1, 1, 1]} : vector<2x16x1536xf32> to vector<2x13x128xf32>
    %19 = arith.addf %17, %18 : vector<2x13x128xf32>
    %20 = vector.extract_strided_slice %2 {offsets = [0, 3, 768], sizes = [2, 13, 128], strides = [1, 1, 1]} : vector<2x16x1536xf32> to vector<2x13x128xf32>
    %21 = arith.addf %19, %20 : vector<2x13x128xf32>
    %cst_10 = arith.constant dense<0xFF800000> : vector<2x128xf32>
    %22 = vector.multi_reduction <maximumf>, %21, %cst_10 [1] : vector<2x13x128xf32> to vector<2x128xf32>
    %c1 = arith.constant 1 : index
    %c0_11 = arith.constant 0 : index
    %23 = vector.load %arg3[%c1, %c0_11] : memref<3x128xf32, #tpu.memory_space<vmem>>, vector<1x128xf32>
    %24 = vector.broadcast %23 : vector<1x128xf32> to vector<2x128xf32>
    %25 = arith.addf %22, %24 : vector<2x128xf32>
    %cst_12 = arith.constant 0.000000e+00 : f32
    %26 = vector.broadcast %cst_12 : f32 to vector<2x128xf32>
    %27 = arith.maximumf %25, %26 : vector<2x128xf32>
    %c0_13 = arith.constant 0 : index
    %c128 = arith.constant 128 : index
    %28 = vector.load %arg4[%c0_13, %c128] : memref<2x384xf32, #tpu.memory_space<vmem>>, vector<2x128xf32>
    tpu.vector_store %arg4[%c0_13, %c128], %27 {strides = array<i32>} : memref<2x384xf32, #tpu.memory_space<vmem>>, vector<2x128xf32>,
    %29 = vector.extract_strided_slice %2 {offsets = [0, 0, 896], sizes = [2, 12, 128], strides = [1, 1, 1]} : vector<2x16x1536xf32> to vector<2x12x128xf32>
    %30 = vector.extract_strided_slice %2 {offsets = [0, 1, 1024], sizes = [2, 12, 128], strides = [1, 1, 1]} : vector<2x16x1536xf32> to vector<2x12x128xf32>
    %31 = arith.addf %29, %30 : vector<2x12x128xf32>
    %32 = vector.extract_strided_slice %2 {offsets = [0, 2, 1152], sizes = [2, 12, 128], strides = [1, 1, 1]} : vector<2x16x1536xf32> to vector<2x12x128xf32>
    %33 = arith.addf %31, %32 : vector<2x12x128xf32>
    %34 = vector.extract_strided_slice %2 {offsets = [0, 3, 1280], sizes = [2, 12, 128], strides = [1, 1, 1]} : vector<2x16x1536xf32> to vector<2x12x128xf32>
    %35 = arith.addf %33, %34 : vector<2x12x128xf32>
    %36 = vector.extract_strided_slice %2 {offsets = [0, 4, 1408], sizes = [2, 12, 128], strides = [1, 1, 1]} : vector<2x16x1536xf32> to vector<2x12x128xf32>
    %37 = arith.addf %35, %36 : vector<2x12x128xf32>
    %cst_14 = arith.constant dense<0xFF800000> : vector<2x128xf32>
    %38 = vector.multi_reduction <maximumf>, %37, %cst_14 [1] : vector<2x12x128xf32> to vector<2x128xf32>
    %c2 = arith.constant 2 : index
    %c0_15 = arith.constant 0 : index
    %39 = vector.load %arg3[%c2, %c0_15] : memref<3x128xf32, #tpu.memory_space<vmem>>, vector<1x128xf32>
    %40 = vector.broadcast %39 : vector<1x128xf32> to vector<2x128xf32>
    %41 = arith.addf %38, %40 : vector<2x128xf32>
    %cst_16 = arith.constant 0.000000e+00 : f32
    %42 = vector.broadcast %cst_16 : f32 to vector<2x128xf32>
    %43 = arith.maximumf %41, %42 : vector<2x128xf32>
    %c0_17 = arith.constant 0 : index
    %c256 = arith.constant 256 : index
    %44 = vector.load %arg4[%c0_17, %c256] : memref<2x384xf32, #tpu.memory_space<vmem>>, vector<2x128xf32>
    tpu.vector_store %arg4[%c0_17, %c256], %43 {strides = array<i32>} : memref<2x384xf32, #tpu.memory_space<vmem>>, vector<2x128xf32>,
    return
  }
  func.func @transform_0(%arg0: i32) -> (i32, i32, i32) {
    %c0_i32 = arith.constant 0 : i32
    %c0_i32_0 = arith.constant 0 : i32
    %c0_i32_1 = arith.constant 0 : i32
    return %arg0, %c0_i32, %c0_i32_0 : i32, i32, i32
  }
  func.func @transform_1(%arg0: i32) -> (i32, i32) {
    %c0_i32 = arith.constant 0 : i32
    %c0_i32_0 = arith.constant 0 : i32
    %c0_i32_1 = arith.constant 0 : i32
    return %c0_i32, %c0_i32_0 : i32, i32
  }
  func.func @transform_2(%arg0: i32) -> (i32, i32) {
    %c0_i32 = arith.constant 0 : i32
    %c0_i32_0 = arith.constant 0 : i32
    %c0_i32_1 = arith.constant 0 : i32
    return %c0_i32, %c0_i32_0 : i32, i32
  }
  func.func @transform_3(%arg0: i32) -> (i32, i32) {
    %c0_i32 = arith.constant 0 : i32
    %c0_i32_0 = arith.constant 0 : i32
    return %arg0, %c0_i32 : i32, i32
  }
}

</mosaic_0001>

<bundles_post_ra>
// kernel: tpu_custom_call.1
= control target key start
LH: loop header
LB: loop body
LE: loop exit
PB: predicated region body
PF: predicated region fallthrough
CT: control target
= control target key end

     0   :  { %8 = vsyncpa [#allocation3], 0  ;;  %s863_s0 = inlined_call_operand.vmem [shape: bf16[2,16,8], index: 0, kind: input, shape index: {}]   ;;  %s864_s1 = inlined_call_operand.hbm [shape: bf16[8,1536], index: 1, kind: input, shape index: {}]   ;;  %s865_s2 = inlined_call_operand.vmem [shape: f32[3,128], index: 2, kind: input, shape index: {}]   ;;  %s866_s3 = inlined_call_operand.hbm [shape: f32[2,384], index: 3, kind: output, shape index: {}]  }
   0x1   :  { %9 = vsyncpa [#allocation4], 0  ;;  %s17_s14 = sshll.u32 %s864_s1, 4  ;;  %s730_s15 = smov [#allocation2]   ;;  %s18_s14 = int_to_ptr.hbm [resolvable:$true] %s17_s14 }
   0x2   :  { %s19_s16 = sshll.u32 %s730_s15, 4  ;;  %s20_s16 = int_to_ptr.vmem [resolvable:$true] %s19_s16 }
   0x3   :  { %22 = dma.hbm_to_vmem [thread:$0]  %s18_s14, 768, %s20_s16, [#allocation3]  }
   0x4   :  { %726 = dma.done.wait [#allocation3], 768  }
   0x5   :  { %727 = vsyncadd [#allocation3], 4294966528  ;;  %v34_v0 = vld [vmem:[#allocation2] sm:$0xff]  ;;  %vm87_vm0 = vcmask 1043456   ;;  %v35_v1 = vld [vmem:[#allocation2 + $0x8] sm:$0xff]  ;;  %vm80_vm1 = vcmask 64512  }
   0x6   :  { %v56_v2 = vunpack.c.l.b16 %v34_v0  ;;  %v57_v3 = vunpack.c.h.b16 %v34_v0  ;;  %v58_v4 = vunpack.c.l.b16 %v35_v1  ;;  %v59_v5 = vunpack.c.h.b16 %v35_v1  ;;  %v37_v6 = vld [vmem:[#allocation2 + $0x18] sm:$0xff]  ;;  %v36_v7 = vld [vmem:[#allocation2 + $0x10] sm:$0xff]  ;;  %v671_v24 = vld [vmem:[%s863_s0] sm:$0xff]  ;;  %s731_s25 = smov [#allocation5]   ;;  %s629_s29 = sshll.u32 %s866_s3, 4  ;;  %s630_s29 = int_to_ptr.hbm [resolvable:$true] %s629_s29 }
   0x7   :  { %v62_v8 = vunpack.c.l.b16 %v37_v6  ;;  %v60_v9 = vunpack.c.l.b16 %v36_v7  ;;  %v63_v10 = vunpack.c.h.b16 %v37_v6  ;;  %v61_v11 = vunpack.c.h.b16 %v36_v7  ;;  %v39_v29 = vld [vmem:[#allocation2 + $0x28] sm:$0xff]  ;;  %v38_v30 = vld [vmem:[#allocation2 + $0x20] sm:$0xff]  ;;  %s627_s26 = sshll.u32 %s731_s25, 4  ;;  %s628_s26 = int_to_ptr.vmem [resolvable:$true] %s627_s26 }
   0x8   :  { %v68_v12 = vpack.c.b16 %v56_v2, %v56_v2  ;;  %v69_v13 = vpack.c.b16 %v57_v3, %v57_v3  ;;  %v70_v14 = vpack.c.b16 %v58_v4, %v58_v4  ;;  %v71_v15 = vpack.c.b16 %v59_v5, %v59_v5  ;;  %v672_v43 = vld [vmem:[%s863_s0 + $0x8] sm:$0xff] }
   0x9   :  { %v74_v16 = vpack.c.b16 %v62_v8, %v62_v8  ;;  %v72_v17 = vpack.c.b16 %v60_v9, %v60_v9  ;;  %v75_v18 = vpack.c.b16 %v63_v10, %v63_v10  ;;  %v73_v19 = vpack.c.b16 %v61_v11, %v61_v11 }
   0xa   :  { %v89_v20 = vsel %vm87_vm0, %v68_v12, 0  ;;  %v92_v21 = vsel %vm87_vm0, %v69_v13, 0  ;;  %v95_v22 = vsel %vm87_vm0, %v70_v14, 0  ;;  %v98_v23 = vsel %vm87_vm0, %v71_v15, 0 }
   0xb   :  { %131 = vmatpush.bf16.msra.mxu0 %v89_v20  ;;  %150 = vmatpush.bf16.msra.mxu1 %v92_v21  ;;  %v107_v25 = vsel %vm87_vm0, %v74_v16, 0  ;;  %v101_v26 = vsel %vm87_vm0, %v72_v17, 0  ;;  %v110_v27 = vsel %vm87_vm0, %v75_v18, 0  ;;  %v104_v28 = vsel %vm87_vm0, %v73_v19, 0 }
   0xc   :  { %169 = vmatpush.bf16.msra.mxu2 %v95_v22  ;;  %188 = vmatpush.bf16.msra.mxu3 %v98_v23  ;;  %v66_v31 = vunpack.c.l.b16 %v39_v29  ;;  %v64_v32 = vunpack.c.l.b16 %v38_v30  ;;  %v67_v33 = vunpack.c.h.b16 %v39_v29  ;;  %v65_v34 = vunpack.c.h.b16 %v38_v30 }
   0xd   :  { %vm356_vm2 = vcmask 1046528   ;;  %vm375_vm3 = vcmask 1045504   ;;  %vm469_vm4 = vcmask 1044480   ;;  %vm419_vm5 = vcmask 1041409  }
   0xe   :  { %647 = vmatmul.msk.bf16.vlgmr.msra.gmra.mxu0 %vm80_vm1, %v671_v24  ;;  %649 = vmatmul.msk.bf16.vlgmr.msra.gmra.mxu1 %vm80_vm1, %v671_v24  ;;  %v78_v35 = vpack.c.b16 %v66_v31, %v66_v31  ;;  %v76_v36 = vpack.c.b16 %v64_v32, %v64_v32  ;;  %v79_v37 = vpack.c.b16 %v67_v33, %v67_v33  ;;  %vm421_vm6 = vcmask 1043459  }
   0xf   :  { %207 = vmatpush.bf16.msrb.mxu0 %v101_v26  ;;  %651 = vmatmul.msk.bf16.vlgmr.msra.gmra.mxu2 %vm80_vm1, %v671_v24  ;;  %v77_v38 = vpack.c.b16 %v65_v34, %v65_v34  ;;  %vm423_vm7 = vcmask 1045509   ;;  %vm425_vm8 = vcmask 1047559  }
  0x10   :  { %245 = vmatpush.bf16.msrb.mxu2 %v107_v25  ;;  %653 = vmatmul.msk.bf16.vlgmr.msra.gmra.mxu3 %vm80_vm1, %v671_v24  ;;  %v119_v39 = vsel %vm87_vm0, %v78_v35, 0  ;;  %v113_v40 = vsel %vm87_vm0, %v76_v36, 0  ;;  %v122_v41 = vsel %vm87_vm0, %v79_v37, 0 }
  0x11   :  { %264 = vmatpush.bf16.msrb.mxu3 %v110_v27  ;;  %226 = vmatpush.bf16.msrb.mxu1 %v104_v28  ;;  %v116_v42 = vsel %vm87_vm0, %v77_v38, 0 }
  0x13   :  { %283 = vmatpush.bf16.msra.mxu0 %v113_v40 }
  0x14   :  { %321 = vmatpush.bf16.msra.mxu2 %v119_v39 }
  0x15   :  { %340 = vmatpush.bf16.msra.mxu3 %v122_v41  ;;  %302 = vmatpush.bf16.msra.mxu1 %v116_v42 }
  0x1e   :  { %648 = vmatmul.msk.bf16.gmra.mxu0 %vm80_vm1, %v672_v43  ;;  %650 = vmatmul.msk.bf16.gmra.mxu1 %vm80_vm1, %v672_v43 }
  0x1f   :  { %652 = vmatmul.msk.bf16.gmra.mxu2 %vm80_vm1, %v672_v43 }
  0x20   :  { %654 = vmatmul.msk.bf16.gmra.mxu3 %vm80_vm1, %v672_v43 }
  0x2e   :  { %655 = vmatmul.msk.bf16.vlgmr.msrb.gmra.mxu0 %vm80_vm1, %v671_v24  ;;  %657 = vmatmul.msk.bf16.vlgmr.msrb.gmra.mxu1 %vm80_vm1, %v671_v24 }
  0x2f   :  { %659 = vmatmul.msk.bf16.vlgmr.msrb.gmra.mxu2 %vm80_vm1, %v671_v24 }
  0x30   :  { %661 = vmatmul.msk.bf16.vlgmr.msrb.gmra.mxu3 %vm80_vm1, %v671_v24 }
  0x3e   :  { %656 = vmatmul.msk.bf16.gmra.mxu0 %vm80_vm1, %v672_v43  ;;  %658 = vmatmul.msk.bf16.gmra.mxu1 %vm80_vm1, %v672_v43 }
  0x3f   :  { %660 = vmatmul.msk.bf16.gmra.mxu2 %vm80_vm1, %v672_v43 }
  0x40   :  { %662 = vmatmul.msk.bf16.gmra.mxu3 %vm80_vm1, %v672_v43 }
  0x4e   :  { %663 = vmatmul.msk.bf16.vlgmr.msra.gmra.mxu0 %vm80_vm1, %v671_v24  ;;  %665 = vmatmul.msk.bf16.vlgmr.msra.gmra.mxu1 %vm80_vm1, %v671_v24 }
  0x4f   :  { %667 = vmatmul.msk.bf16.vlgmr.msra.gmra.mxu2 %vm80_vm1, %v671_v24 }
  0x50   :  { %669 = vmatmul.msk.bf16.vlgmr.msra.gmra.mxu3 %vm80_vm1, %v671_v24 }
  0x5e   :  { %664 = vmatmul.msk.bf16.gmra.mxu0 %vm80_vm1, %v672_v43  ;;  %666 = vmatmul.msk.bf16.gmra.mxu1 %vm80_vm1, %v672_v43 }
  0x5f   :  { %668 = vmatmul.msk.bf16.gmra.mxu2 %vm80_vm1, %v672_v43 }
  0x60   :  { %670 = vmatmul.msk.bf16.gmra.mxu3 %vm80_vm1, %v672_v43  ;;  %v675_v43 = vld [vmem:[%s865_s2] ss:$0 sm:$0xff] }
  0x8b   :  { %v133_v44 = vpop.f32.mrf.mxu0  ;;  %v152_v45 = vpop.f32.mrf.mxu1 }
  0x8c   :  { %v357_v51 = vrot.slane %v152_v45, 1 }
  0x92   :  { %v171_v46 = vpop.f32.mrf.mxu2 }
  0x93   :  { %v190_v47 = vpop.f32.mrf.mxu3  ;;  %v135_v48 = vpop.f32.mrf.mxu0  ;;  %v376_v55 = vrot.slane %v171_v46, 2 }
  0x94   :  { %v154_v49 = vpop.f32.mrf.mxu1 }
  0x95   :  { %v358_v50 = vrot.slane %v154_v49, 1 }
  0x97   :  { %v359_v52 = vsel %vm356_vm2, %v357_v51, %v358_v50  ;;  %v368_v56 = vadd.f32 %v358_v50, %v135_v48 }
  0x98   :  { %v367_v60 = vadd.f32 %v359_v52, %v133_v44 }
  0x9a   :  { %v173_v53 = vpop.f32.mrf.mxu2 }
  0x9b   :  { %v192_v54 = vpop.f32.mrf.mxu3  ;;  %v377_v57 = vrot.slane %v173_v53, 2  ;;  %v138_v58 = vpop.f32.mrf.mxu0 }
  0x9c   :  { %v157_v59 = vpop.f32.mrf.mxu1 }
  0x9d   :  { %v378_v61 = vsel %vm375_vm3, %v376_v55, %v377_v57  ;;  %v387_v62 = vadd.f32 %v377_v57, %v368_v56  ;;  %v360_v8 = vrot.slane %v157_v59, 1 }
  0x9e   :  { %v386_v63 = vadd.f32 %v378_v61, %v367_v60 }
  0x9f   :  { %v390_v0 = vsel %vm375_vm3, %v387_v62, -inf }
  0xa0   :  { %v391_v1 = vmax.f32 %v386_v63, %v390_v0 }
  0xa2   :  { %v176_v2 = vpop.f32.mrf.mxu2  ;;  %v392_v7 = vrot.slane %v391_v1, 4 }
  0xa3   :  { %v800_v3 = vpop.f32.mrf.mxu3  ;;  %v140_v4 = vpop.f32.mrf.mxu0  ;;  %v379_v13 = vrot.slane %v176_v2, 2 }
  0xa4   :  { %v159_v5 = vpop.f32.mrf.mxu1  ;;  %v393_v10 = vmax.f32 %v391_v1, %v392_v7 }
  0xa5   :  { %v361_v6 = vrot.slane %v159_v5, 1 }
  0xa6   :  { %v394_v21 = vrot.slane %v393_v10, 2 }
  0xa7   :  { %v362_v9 = vsel %vm356_vm2, %v360_v8, %v361_v6  ;;  %v370_v14 = vadd.f32 %v361_v6, %v140_v4 }
  0xa8   :  { %v369_v18 = vadd.f32 %v362_v9, %v138_v58  ;;  %v395_v25 = vmax.f32 %v393_v10, %v394_v21 }
  0xaa   :  { %v178_v11 = vpop.f32.mrf.mxu2  ;;  %v396_v34 = vrot.slane %v395_v25, 1 }
  0xab   :  { %v803_v12 = vpop.f32.mrf.mxu3  ;;  %v380_v15 = vrot.slane %v178_v11, 2  ;;  %v209_v16 = vpop.f32.mrf.mxu0 }
  0xac   :  { %v228_v17 = vpop.f32.mrf.mxu1  ;;  %v433_v32 = vrot.slane %v209_v16, 1  ;;  %v397_v42 = vmax.f32 %v395_v25, %v396_v34 }
  0xad   :  { %v381_v19 = vsel %vm375_vm3, %v379_v13, %v380_v15  ;;  %v389_v20 = vadd.f32 %v380_v15, %v370_v14  ;;  %v451_v41 = vrot.slane %v228_v17, 2 }
  0xae   :  { %v388_v22 = vadd.f32 %v381_v19, %v369_v18  ;;  %v408_v57 = vadd.f32 %v675_v43, %v397_v42 }
  0xaf   :  { %v398_v23 = vsel %vm375_vm3, %v389_v20, -inf }
  0xb0   :  { %v399_v24 = vmax.f32 %v388_v22, %v398_v23  ;;  %v410_v62 = vmax.f32 %v408_v57, 0.0 }
  0xb2   :  { %v400_v26 = vrot.slane %v399_v24, 4  ;;  %v247_v27 = vpop.f32.mrf.mxu2 }
  0xb3   :  { %v807_v28 = vpop.f32.mrf.mxu3  ;;  %v211_v29 = vpop.f32.mrf.mxu0  ;;  %v470_v48 = vrot.slane %v247_v27, 3 }
  0xb4   :  { %v230_v30 = vpop.f32.mrf.mxu1  ;;  %v401_v31 = vmax.f32 %v399_v24, %v400_v26  ;;  %v434_v33 = vrot.slane %v211_v29, 1 }
  0xb5   :  { %v452_v38 = vrot.slane %v230_v30, 2 }
  0xb6   :  { %v402_v35 = vrot.slane %v401_v31, 2  ;;  %v435_v36 = vsel %vm356_vm2, %v433_v32, %v434_v33  ;;  %v444_v37 = vadd.f32 %v434_v33, %v192_v54 }
  0xb7   :  { %v443_v40 = vadd.f32 %v435_v36, %v190_v47  ;;  %v453_v49 = vsel %vm375_vm3, %v451_v41, %v452_v38 }
  0xb8   :  { %v403_v39 = vmax.f32 %v401_v31, %v402_v35  ;;  %v462_v50 = vadd.f32 %v452_v38, %v444_v37 }
  0xb9   :  { %v461_v47 = vadd.f32 %v453_v49, %v443_v40 }
  0xba   :  { %v404_v44 = vrot.slane %v403_v39, 1  ;;  %v249_v45 = vpop.f32.mrf.mxu2 }
  0xbb   :  { %v813_v46 = vpop.f32.mrf.mxu3  ;;  %v471_v51 = vrot.slane %v249_v45, 3  ;;  %v214_v52 = vpop.f32.mrf.mxu0 }
  0xbc   :  { %v233_v53 = vpop.f32.mrf.mxu1  ;;  %v405_v54 = vmax.f32 %v403_v39, %v404_v44  ;;  %v436_v6 = vrot.slane %v214_v52, 1 }
  0xbd   :  { %v472_v55 = vsel %vm469_vm4, %v470_v48, %v471_v51  ;;  %v481_v56 = vadd.f32 %v471_v51, %v462_v50  ;;  %v454_v18 = vrot.slane %v233_v53, 2 }
  0xbe   :  { %v409_v58 = vadd.f32 %v675_v43, %v405_v54  ;;  %v480_v59 = vadd.f32 %v472_v55, %v461_v47  ;;  %v676_v54 = vld [vmem:[%s865_s2 + $0x1] ss:$0 sm:$0xff] }
  0xbf   :  { %v484_v60 = vsel %vm469_vm4, %v481_v56, -inf }
  0xc0   :  { %v411_v61 = vmax.f32 %v409_v58, 0.0  ;;  %v485_v0 = vmax.f32 %v480_v59, %v484_v60 }
  0xc2   :  { %v418_v63 = vrot.slane %v411_v61, 7  ;;  %v252_v1 = vpop.f32.mrf.mxu2  ;;  %v486_v10 = vrot.slane %v485_v0, 4 }
  0xc3   :  { %v818_v2 = vpop.f32.mrf.mxu3  ;;  %v216_v4 = vpop.f32.mrf.mxu0  ;;  %v473_v22 = vrot.slane %v252_v1, 3 }
  0xc4   :  { %v235_v5 = vpop.f32.mrf.mxu1  ;;  %v437_v7 = vrot.slane %v216_v4, 1  ;;  %v420_v8 = vsel %vm419_vm5, %v418_v63, %v410_v62  ;;  %v487_v19 = vmax.f32 %v485_v0, %v486_v10 }
  0xc5   :  { %v422_v9 = vsel %vm421_vm6, %v418_v63, %v420_v8  ;;  %v455_v14 = vrot.slane %v235_v5, 2 }
  0xc6   :  { %v438_v11 = vsel %vm356_vm2, %v436_v6, %v437_v7  ;;  %v446_v13 = vadd.f32 %v437_v7, %v803_v12  ;;  %v424_v15 = vsel %vm423_vm7, %v418_v63, %v422_v9 }
  0xc7   :  { %v445_v16 = vadd.f32 %v438_v11, %v800_v3  ;;  %v426_v17 = vsel %vm425_vm8, %v418_v63, %v424_v15  ;;  %v456_v23 = vsel %vm375_vm3, %v454_v18, %v455_v14  ;;  %v488_v3 = vrot.slane %v487_v19, 2 }
  0xc8   :  { %428 = vst [vmem:[#allocation5] sm:$0x3] %v426_v17  ;;  %v464_v24 = vadd.f32 %v455_v14, %v446_v13 }
  0xc9   :  { %v463_v27 = vadd.f32 %v456_v23, %v445_v16  ;;  %v489_v34 = vmax.f32 %v487_v19, %v488_v3 }
  0xca   :  { %v254_v20 = vpop.f32.mrf.mxu2 }
  0xcb   :  { %v827_v21 = vpop.f32.mrf.mxu3  ;;  %v474_v25 = vrot.slane %v254_v20, 3  ;;  %v285_v26 = vpop.f32.mrf.mxu0  ;;  %v490_v43 = vrot.slane %v489_v34, 1 }
  0xcc   :  { %v304_v12 = vpop.f32.mrf.mxu1  ;;  %v521_v41 = vrot.slane %v285_v26, 1 }
  0xcd   :  { %v475_v29 = vsel %vm469_vm4, %v473_v22, %v474_v25  ;;  %v483_v30 = vadd.f32 %v474_v25, %v464_v24  ;;  %v539_v52 = vrot.slane %v304_v12, 2  ;;  %v491_v53 = vmax.f32 %v489_v34, %v490_v43 }
  0xce   :  { %v482_v31 = vadd.f32 %v475_v29, %v463_v27 }
  0xcf   :  { %v492_v32 = vsel %vm469_vm4, %v483_v30, -inf  ;;  %v502_v5 = vadd.f32 %v676_v54, %v491_v53 }
  0xd0   :  { %v493_v33 = vmax.f32 %v482_v31, %v492_v32 }
  0xd1   :  { %v504_v14 = vmax.f32 %v502_v5, 0.0 }
  0xd2   :  { %v494_v35 = vrot.slane %v493_v33, 4  ;;  %v323_v36 = vpop.f32.mrf.mxu2 }
  0xd3   :  { %v342_v37 = vpop.f32.mrf.mxu3  ;;  %v287_v38 = vpop.f32.mrf.mxu0  ;;  %v557_v55 = vrot.slane %v323_v36, 3 }
  0xd4   :  { %v306_v39 = vpop.f32.mrf.mxu1  ;;  %v495_v40 = vmax.f32 %v493_v33, %v494_v35  ;;  %v522_v42 = vrot.slane %v287_v38, 1 }
  0xd5   :  { %v540_v49 = vrot.slane %v306_v39, 2 }
  0xd6   :  { %v496_v44 = vrot.slane %v495_v40, 2  ;;  %v523_v45 = vsel %vm356_vm2, %v521_v41, %v522_v42  ;;  %v532_v48 = vadd.f32 %v522_v42, %v813_v46 }
  0xd7   :  { %v531_v51 = vadd.f32 %v523_v45, %v807_v28  ;;  %v541_v58 = vsel %vm375_vm3, %v539_v52, %v540_v49  ;;  %v575_v28 = vrot.slane %v342_v37, 4 }
  0xd8   :  { %v497_v50 = vmax.f32 %v495_v40, %v496_v44  ;;  %v550_v59 = vadd.f32 %v540_v49, %v532_v48 }
  0xd9   :  { %v549_v0 = vadd.f32 %v541_v58, %v531_v51  ;;  %v677_v58 = vld [vmem:[%s865_s2 + $0x2] ss:$0 sm:$0xff] }
  0xda   :  { %v498_v47 = vrot.slane %v497_v50, 1  ;;  %v325_v56 = vpop.f32.mrf.mxu2 }
  0xdb   :  { %v344_v57 = vpop.f32.mrf.mxu3  ;;  %v558_v60 = vrot.slane %v325_v56, 3  ;;  %v290_v46 = vpop.f32.mrf.mxu0 }
  0xdc   :  { %v576_v61 = vrot.slane %v344_v57, 4  ;;  %v309_v62 = vpop.f32.mrf.mxu1  ;;  %v499_v63 = vmax.f32 %v497_v50, %v498_v47  ;;  %v524_v20 = vrot.slane %v290_v46, 1 }
  0xdd   :  { %v559_v1 = vsel %vm469_vm4, %v557_v55, %v558_v60  ;;  %v568_v4 = vadd.f32 %v558_v60, %v550_v59  ;;  %v542_v32 = vrot.slane %v309_v62, 2 }
  0xde   :  { %v503_v6 = vadd.f32 %v676_v54, %v499_v63  ;;  %v567_v7 = vadd.f32 %v559_v1, %v549_v0  ;;  %v577_v8 = vsel %vm87_vm0, %v575_v28, %v576_v61 }
  0xdf   :  { %v586_v9 = vadd.f32 %v576_v61, %v568_v4 }
  0xe0   :  { %v505_v10 = vmax.f32 %v503_v6, 0.0  ;;  %v585_v11 = vadd.f32 %v577_v8, %v567_v7 }
  0xe1   :  { %v589_v13 = vsel %vm87_vm0, %v586_v9, -inf }
  0xe2   :  { %v510_v15 = vrot.slane %v505_v10, 7  ;;  %v328_v16 = vpop.f32.mrf.mxu2  ;;  %v590_v19 = vmax.f32 %v585_v11, %v589_v13 }
  0xe3   :  { %v347_v17 = vpop.f32.mrf.mxu3  ;;  %v292_v18 = vpop.f32.mrf.mxu0  ;;  %v560_v33 = vrot.slane %v328_v16, 3 }
  0xe4   :  { %v525_v22 = vrot.slane %v292_v18, 1  ;;  %v311_v23 = vpop.f32.mrf.mxu1  ;;  %v511_v24 = vsel %vm419_vm5, %v510_v15, %v504_v14  ;;  %v591_v30 = vrot.slane %v590_v19, 4  ;;  %v578_v41 = vrot.slane %v347_v17, 4 }
  0xe5   :  { %v512_v25 = vsel %vm421_vm6, %v510_v15, %v511_v24  ;;  %v543_v27 = vrot.slane %v311_v23, 2 }
  0xe6   :  { %v526_v26 = vsel %vm356_vm2, %v524_v20, %v525_v22  ;;  %v534_v12 = vadd.f32 %v525_v22, %v827_v21  ;;  %v513_v29 = vsel %vm423_vm7, %v510_v15, %v512_v25  ;;  %v592_v40 = vmax.f32 %v590_v19, %v591_v30 }
  0xe7   :  { %v533_v3 = vadd.f32 %v526_v26, %v818_v2  ;;  %v514_v31 = vsel %vm425_vm8, %v510_v15, %v513_v29  ;;  %v544_v36 = vsel %vm375_vm3, %v542_v32, %v543_v27 }
  0xe8   :  { %516 = vst [vmem:[#allocation5 + $0x2] sm:$0x3] %v514_v31  ;;  %v552_v37 = vadd.f32 %v543_v27, %v534_v12  ;;  %v593_v48 = vrot.slane %v592_v40, 2 }
  0xe9   :  { %v551_v21 = vadd.f32 %v544_v36, %v533_v3 }
  0xea   :  { %v330_v34 = vpop.f32.mrf.mxu2  ;;  %v594_v52 = vmax.f32 %v592_v40, %v593_v48 }
  0xeb   :  { %v349_v35 = vpop.f32.mrf.mxu3  ;;  %v561_v38 = vrot.slane %v330_v34, 3 }
  0xec   :  { %v579_v39 = vrot.slane %v349_v35, 4  ;;  %v595_v47 = vrot.slane %v594_v52, 1 }
  0xed   :  { %v562_v42 = vsel %vm469_vm4, %v560_v33, %v561_v38  ;;  %v570_v43 = vadd.f32 %v561_v38, %v552_v37 }
  0xee   :  { %v569_v44 = vadd.f32 %v562_v42, %v551_v21  ;;  %v580_v2 = vsel %vm87_vm0, %v578_v41, %v579_v39  ;;  %v596_v57 = vmax.f32 %v594_v52, %v595_v47 }
  0xef   :  { %v588_v45 = vadd.f32 %v579_v39, %v570_v43 }
  0xf0   :  { %v587_v49 = vadd.f32 %v580_v2, %v569_v44  ;;  %v607_v61 = vadd.f32 %v677_v58, %v596_v57 }
  0xf1   :  { %v597_v50 = vsel %vm87_vm0, %v588_v45, -inf }
  0xf2   :  { %v598_v51 = vmax.f32 %v587_v49, %v597_v50  ;;  %v609_v63 = vmax.f32 %v607_v61, 0.0 }
  0xf4   :  { %v599_v53 = vrot.slane %v598_v51, 4 }
  0xf6   :  { %v600_v54 = vmax.f32 %v598_v51, %v599_v53 }
  0xf8   :  { %v601_v55 = vrot.slane %v600_v54, 2 }
  0xfa   :  { %v602_v56 = vmax.f32 %v600_v54, %v601_v55 }
  0xfc   :  { %v603_v59 = vrot.slane %v602_v56, 1 }
  0xfe   :  { %v604_v60 = vmax.f32 %v602_v56, %v603_v59 }
 0x100   :  { %v608_v46 = vadd.f32 %v677_v58, %v604_v60 }
 0x102   :  { %v610_v62 = vmax.f32 %v608_v46, 0.0 }
 0x104   :  { %v615_v0 = vrot.slane %v610_v62, 7 }
 0x106   :  { %v616_v28 = vsel %vm419_vm5, %v615_v0, %v609_v63 }
 0x107   :  { %v617_v1 = vsel %vm421_vm6, %v615_v0, %v616_v28 }
 0x108   :  { %v618_v4 = vsel %vm423_vm7, %v615_v0, %v617_v1 }
 0x109   :  { %v619_v5 = vsel %vm425_vm8, %v615_v0, %v618_v4 }
 0x10a   :  { %621 = vst [vmem:[#allocation5 + $0x4] sm:$0x3] %v619_v5 }
 0x10b   :  { %632 = dma.vmem_to_hbm [thread:$0]  %s628_s26, 96, %s630_s29, [#allocation4]  }
 0x10c   :  { %728 = dma.done.wait [#allocation4], 96  }
 0x10d   :  { %729 = vsyncadd [#allocation4], 4294967200 }
 0x10e   :  { %637 = vsyncpa [#allocation3], 1 }
 0x10f   :  { %638 = vsyncpa [#allocation4], 1 }

</bundles_post_ra>
